<compile_context>
chip_gen: v6e
topology: v6e:2x2x1
jax: 0.10.0
libtpu: 0.0.40
codegen_flags: <defaults>
</compile_context>

<pallas_src>
from functools import partial

import jax
import jax.numpy as jnp
from jax.experimental import pallas as pl
from jax.experimental.pallas import tpu as pltpu


def _round_up(n: int, m: int) -> int:
    return ((n + m - 1) // m) * m


def _cdiv(a: int, b: int) -> int:
    return (a + b - 1) // b


_VMEM_LIMIT = 32 * 1024 * 1024  # explicit scoped-VMEM budget (review item 8)


# -----------------------------------------------------------------------------
# Kernel 1: packed q + greedy action, batch in sublanes (training path)
# -----------------------------------------------------------------------------
def _dqn_packed_kernel(out_actions, x_ref, w1_ref, b1_ref, w2_ref, b2_ref, out_ref):
    # x:  (tb, in_states) f32          w1: (in_states, H1P) f32   b1: (1, H1P)
    # w2: (H1P, OUTP=128) f32          b2: (1, OUTP)
    # out: (tb, OUTP) q_dtype; lanes [0, out_actions) = q, lane out_actions = argmax
    x = x_ref[...]
    w1 = w1_ref[...]
    in_states = x.shape[1]

    # fc1 on the VPU: K is tiny (2), skip the MXU push/pop entirely.
    h = x[:, 0:1] * w1[0:1, :]
    for k in range(1, in_states):                       # static unrolled loop
        h = h + x[:, k:k + 1] * w1[k:k + 1, :]
    h = jnp.maximum(h + b1_ref[...], 0.0)               # (tb, H1P) f32

    # out layer on the MXU: (tb, H1P) @ (H1P, 128), f32 accumulation.
    q = jnp.dot(h, w2_ref[...], preferred_element_type=jnp.float32) + b2_ref[...]

    # Fused greedy action over the real (unpadded) action lanes, all in f32.
    col = jax.lax.broadcasted_iota(jnp.int32, q.shape, 1)
    valid = col < out_actions
    qv = jnp.where(valid, q, jnp.float32(-jnp.inf))
    qmax = jnp.max(qv, axis=-1, keepdims=True)
    first = jnp.min(jnp.where(qv == qmax, col, jnp.int32(q.shape[1])),
                    axis=-1, keepdims=True)             # (tb, 1) first argmax index

    # Pack argmax into the spare padded lane `out_actions`; single dense store.
    packed = jnp.where(valid, q,
                       jnp.where(col == out_actions, first.astype(jnp.float32), 0.0))
    out_ref[...] = packed.astype(out_ref.dtype)


# -----------------------------------------------------------------------------
# Kernel 2: action-only, batch in lanes (acting / epsilon-greedy path)
# -----------------------------------------------------------------------------
def _dqn_act_kernel(out_actions, xT_ref, w1_ref, b1_ref, w2_ref, b2_ref, act_ref):
    # xT: (in_states, tbl) f32         w1: (H1P, in_states) torch layout  b1: (H1P, 1)
    # w2: (OUTS=8, H1P)                b2: (OUTS, 1)
    # act: (8, tbl) int32 (action broadcast across sublanes; lane-dense store)
    xT = xT_ref[...]
    w1 = w1_ref[...]
    in_states = xT.shape[0]

    # fc1 as VPU outer products: (H1P, 1) * (1, tbl).
    h = w1[:, 0:1] * xT[0:1, :]
    for k in range(1, in_states):                       # static unrolled loop
        h = h + w1[:, k:k + 1] * xT[k:k + 1, :]
    h = jnp.maximum(h + b1_ref[...], 0.0)               # (H1P, tbl) f32

    # out layer: (OUTS, H1P) @ (H1P, tbl) -> (OUTS, tbl), f32 accumulation.
    q = jnp.dot(w1_ref.dtype.type(1.0) * w2_ref[...], h,
                preferred_element_type=jnp.float32) + b2_ref[...]

    row = jax.lax.broadcasted_iota(jnp.int32, q.shape, 0)
    qv = jnp.where(row < out_actions, q, jnp.float32(-jnp.inf))
    qmax = jnp.max(qv, axis=0, keepdims=True)           # (1, tbl) sublane reduce
    first = jnp.min(jnp.where(qv == qmax, row, jnp.int32(q.shape[0])),
                    axis=0, keepdims=True)              # (1, tbl) int32
    act_ref[...] = jnp.broadcast_to(first, act_ref.shape)


# -----------------------------------------------------------------------------
# Host-side wrappers
# -----------------------------------------------------------------------------
@partial(jax.jit, static_argnames=("out_actions", "block_b", "q_dtype"))
def _dqn_forward_packed(x, w1_p, b1_p, w2_p, b2_p, *, out_actions, block_b, q_dtype):
    """x: (B, in_states) f32 -> packed (Bp, 128) of dtype q_dtype."""
    B, in_states = x.shape
    h1p = w1_p.shape[1]
    outp = w2_p.shape[1]

    # Tile picking: balanced tiles, >= 2 grid steps whenever possible (v7x 2 TCs).
    b8 = _round_up(max(B, 1), 8)
    n_steps = max(_cdiv(b8, block_b), 2 if b8 >= 16 else 1)
    tb = _round_up(_cdiv(b8, n_steps), 8)
    Bp = tb * n_steps
    if Bp != B:
        x = jnp.zeros((Bp, in_states), x.dtype).at[:B, :].set(x)

    return pl.pallas_call(
        partial(_dqn_packed_kernel, out_actions),
        out_shape=jax.ShapeDtypeStruct((Bp, outp), q_dtype),
        grid=(n_steps,),
        in_specs=[
            pl.BlockSpec((tb, in_states), lambda i: (i, 0)),    # x tile
            pl.BlockSpec((in_states, h1p), lambda i: (0, 0)),   # w1 (resident)
            pl.BlockSpec((1, h1p), lambda i: (0, 0)),           # b1
            pl.BlockSpec((h1p, outp), lambda i: (0, 0)),        # w2 (resident)
            pl.BlockSpec((1, outp), lambda i: (0, 0)),          # b2
        ],
        out_specs=pl.BlockSpec((tb, outp), lambda i: (i, 0)),   # lane-dense packed out
        compiler_params=pltpu.CompilerParams(
            dimension_semantics=("parallel",),
            vmem_limit_bytes=_VMEM_LIMIT),
    )(x, w1_p, b1_p, w2_p, b2_p)


@partial(jax.jit, static_argnames=("out_actions", "block_b"))
def _dqn_action_only(x, w1_t, b1_t, w2_t, b2_t, *, out_actions, block_b):
    """x: (B, in_states) f32 -> greedy action (B,) int32 (no q writeback)."""
    B, in_states = x.shape
    h1p = w1_t.shape[0]
    outs = w2_t.shape[0]

    b128 = _round_up(max(B, 1), 128)
    n_steps = max(_cdiv(b128, block_b), 2 if b128 >= 256 else 1)
    tbl = _round_up(_cdiv(b128, n_steps), 128)
    Bp = tbl * n_steps
    # Lane-dense transposed input layout (review item 6).
    xT = jnp.zeros((in_states, Bp), x.dtype).at[:, :B].set(x.T)

    act = pl.pallas_call(
        partial(_dqn_act_kernel, out_actions),
        out_shape=jax.ShapeDtypeStruct((8, Bp), jnp.int32),
        grid=(n_steps,),
        in_specs=[
            pl.BlockSpec((in_states, tbl), lambda i: (0, i)),   # xT tile (lane-dense)
            pl.BlockSpec((h1p, in_states), lambda i: (0, 0)),   # w1 torch layout
            pl.BlockSpec((h1p, 1), lambda i: (0, 0)),           # b1
            pl.BlockSpec((outs, h1p), lambda i: (0, 0)),        # w2 torch layout
            pl.BlockSpec((outs, 1), lambda i: (0, 0)),          # b2
        ],
        out_specs=pl.BlockSpec((8, tbl), lambda i: (0, i)),     # lane-dense actions
        compiler_params=pltpu.CompilerParams(
            dimension_semantics=("parallel",),
            vmem_limit_bytes=_VMEM_LIMIT),
    )(xT, w1_t, b1_t, w2_t, b2_t)
    return act[0, :B]


def prepare_dqn_params(w1, b1, w2, b2):
    """One-time layout glue (hoisted out of the forward path).

    Torch layout in: w1 (h1, in), b1 (h1,), w2 (out, h1), b2 (out,).
    Row layout : zero-padded (in_features, out_features), hidden padded to 8,
                 actions padded to 128 with one spare lane for the fused argmax.
    Col layout : torch orientation, sublane-padded, for the action-only kernel."""
    w1 = jnp.asarray(w1, jnp.float32); b1 = jnp.asarray(b1, jnp.float32)
    w2 = jnp.asarray(w2, jnp.float32); b2 = jnp.asarray(b2, jnp.float32)
    h1, in_states = w1.shape
    out_actions = w2.shape[0]
    h1p = _round_up(h1, 8)                       # review item 7: no 128 pad on K
    outp = _round_up(out_actions + 1, 128)       # +1 spare lane holds the argmax
    outs = _round_up(out_actions, 8)

    w1_p = jnp.zeros((in_states, h1p), jnp.float32).at[:, :h1].set(w1.T)
    b1_p = jnp.zeros((1, h1p), jnp.float32).at[0, :h1].set(b1)
    w2_p = jnp.zeros((h1p, outp), jnp.float32).at[:h1, :out_actions].set(w2.T)
    b2_p = jnp.zeros((1, outp), jnp.float32).at[0, :out_actions].set(b2)

    w1_t = jnp.zeros((h1p, in_states), jnp.float32).at[:h1, :].set(w1)
    b1_t = jnp.zeros((h1p, 1), jnp.float32).at[:h1, 0].set(b1)
    w2_t = jnp.zeros((outs, h1p), jnp.float32).at[:out_actions, :h1].set(w2)
    b2_t = jnp.zeros((outs, 1), jnp.float32).at[:out_actions, 0].set(b2)

    return {"row": (w1_p, b1_p, w2_p, b2_p), "col": (w1_t, b1_t, w2_t, b2_t)}, out_actions


class DQNPallas:
    """Mirror of the PyTorch DQN module; forward == relu(x@W1.T+b1)@W2.T+b2.

    q_dtype=jnp.bfloat16 (default) halves q writeback; use jnp.float32 for exact
    torch numerics. Greedy-action selection is always computed in f32 in-kernel."""

    def __init__(self, w1, b1, w2, b2, *, block_b=2048, q_dtype=jnp.bfloat16):
        self.params, self.out_actions = prepare_dqn_params(w1, b1, w2, b2)
        self.block_b = int(block_b)
        self.q_dtype = q_dtype

    # Preferred training-path API: padded (Bp, 128) packed output, no slice copy.
    # Lanes [0, out_actions) hold q; lane `out_actions` holds the greedy action.
    def packed_q_and_action(self, x):
        return _dqn_forward_packed(x, *self.params["row"],
                                   out_actions=self.out_actions,
                                   block_b=self.block_b, q_dtype=self.q_dtype)

    def q_and_action(self, x):
        packed = self.packed_q_and_action(x)
        B = x.shape[0]
        q = packed[:B, :self.out_actions]
        act = packed[:B, self.out_actions].astype(jnp.int32)
        return q, act

    def __call__(self, x):
        packed = self.packed_q_and_action(x)
        return packed[:x.shape[0], :self.out_actions]

    # Acting / epsilon-greedy path: no q writeback at all.
    def act(self, x):
        return _dqn_action_only(x, *self.params["col"],
                                out_actions=self.out_actions, block_b=self.block_b)


# -----------------------------------------------------------------------------
# Demo / self-check
# -----------------------------------------------------------------------------
def _torch_linear_init(key, out_features, in_features):
    """Mimics torch.nn.Linear default init: U[-1/sqrt(fan_in), +1/sqrt(fan_in)]."""
    kw, kb = jax.random.split(key)
    bound = 1.0 / jnp.sqrt(jnp.asarray(in_features, jnp.float32))
    w = jax.random.uniform(kw, (out_features, in_features), jnp.float32, -bound, bound)
    b = jax.random.uniform(kb, (out_features,), jnp.float32, -bound, bound)
    return w, b


def _check(model_bf16, model_f32, x, w1, b1, w2, b2):
    B = x.shape[0]
    ref = jnp.maximum(x @ w1.T + b1, 0.0) @ w2.T + b2
    ref_max = ref.max(axis=-1)
    rows = jnp.arange(B)

    q, act = model_bf16.q_and_action(x)
    a_only = model_bf16.act(x)
    q32 = model_f32(x)
    jax.block_until_ready((q, act, a_only, q32))

    assert q.shape == (B, model_bf16.out_actions) and q.dtype == jnp.bfloat16
    assert jnp.allclose(q.astype(jnp.float32), ref, atol=3e-2, rtol=3e-2)
    assert act.shape == (B,) and act.dtype == jnp.int32
    assert bool(jnp.all((act >= 0) & (act < model_bf16.out_actions)))
    # Tie-tolerant greedy check (argmax computed on f32 inside the kernel).
    assert bool(jnp.all(ref[rows, act] >= ref_max - 1e-5))
    assert a_only.shape == (B,) and a_only.dtype == jnp.int32
    assert bool(jnp.all(ref[rows, a_only] >= ref_max - 1e-5))
    # f32 model reproduces the torch forward tightly.
    assert q32.dtype == jnp.float32
    assert jnp.allclose(q32, ref, atol=1e-5, rtol=1e-5)


if __name__ == "__main__":
    # Mountain Car: 2-dim state, 3 actions; small hidden layer.
    in_states, h1_nodes, out_actions = 2, 32, 3

    key = jax.random.PRNGKey(0)
    k_x1, k_x2, k_fc1, k_out = jax.random.split(key, 4)

    w1, b1 = _torch_linear_init(k_fc1, h1_nodes, in_states)
    w2, b2 = _torch_linear_init(k_out, out_actions, h1_nodes)

    model_bf16 = DQNPallas(w1, b1, w2, b2)                         # default bf16 q store
    model_f32 = DQNPallas(w1, b1, w2, b2, q_dtype=jnp.float32)     # exact torch numerics

    # Small acting-style batch (single grid step).
    x_small = jax.random.normal(k_x1, (8, in_states), jnp.float32)
    _check(model_bf16, model_f32, x_small, w1, b1, w2, b2)

    # Larger replay-buffer-style batch (exercises grid >= 2 + batch padding).
    x_large = jax.random.normal(k_x2, (300, in_states), jnp.float32)
    _check(model_bf16, model_f32, x_large, w1, b1, w2, b2)

    print("KERNEL_OK")
</pallas_src>

<mosaic_0001>
module attributes {stable_mosaic.version = 11 : i64} {
  func.func @_dqn_packed_kernel(%arg0: i32, %arg1: memref<8x2xf32, #tpu.memory_space<vmem>>, %arg2: memref<2x32xf32, #tpu.memory_space<vmem>>, %arg3: memref<1x32xf32, #tpu.memory_space<vmem>>, %arg4: memref<32x128xf32, #tpu.memory_space<vmem>>, %arg5: memref<1x128xf32, #tpu.memory_space<vmem>>, %arg6: memref<8x128xbf16, #tpu.memory_space<vmem>>) attributes {dimension_semantics = [#tpu.dimension_semantics<parallel>], iteration_bounds = array<i64: 1>, scalar_prefetch = 0 : i64, scratch_operands = 0 : i64, tpu.core_type = #tpu.core_type<tc>, window_params = [{transform_indices = @transform_0, window_bounds = array<i64: 8, 2>}, {pipeline_mode = #tpu.pipeline_mode<synchronous>, transform_indices = @transform_1, window_bounds = array<i64: 2, 32>}, {pipeline_mode = #tpu.pipeline_mode<synchronous>, transform_indices = @transform_2, window_bounds = array<i64: 1, 32>}, {pipeline_mode = #tpu.pipeline_mode<synchronous>, transform_indices = @transform_3, window_bounds = array<i64: 32, 128>}, {pipeline_mode = #tpu.pipeline_mode<synchronous>, transform_indices = @transform_4, window_bounds = array<i64: 1, 128>}, {transform_indices = @transform_5, window_bounds = array<i64: 8, 128>}]} {
    %c0 = arith.constant 0 : index
    %c0_0 = arith.constant 0 : index
    %0 = vector.load %arg1[%c0, %c0_0] : memref<8x2xf32, #tpu.memory_space<vmem>>, vector<8x2xf32>
    %c0_1 = arith.constant 0 : index
    %c0_2 = arith.constant 0 : index
    %1 = vector.load %arg2[%c0_1, %c0_2] : memref<2x32xf32, #tpu.memory_space<vmem>>, vector<2x32xf32>
    %2 = vector.extract_strided_slice %0 {offsets = [0, 0], sizes = [8, 1], strides = [1, 1]} : vector<8x2xf32> to vector<8x1xf32>
    %3 = vector.extract_strided_slice %1 {offsets = [0, 0], sizes = [1, 32], strides = [1, 1]} : vector<2x32xf32> to vector<1x32xf32>
    %4 = vector.broadcast %2 : vector<8x1xf32> to vector<8x32xf32>
    %5 = vector.broadcast %3 : vector<1x32xf32> to vector<8x32xf32>
    %6 = arith.mulf %4, %5 : vector<8x32xf32>
    %7 = vector.extract_strided_slice %0 {offsets = [0, 1], sizes = [8, 1], strides = [1, 1]} : vector<8x2xf32> to vector<8x1xf32>
    %8 = vector.extract_strided_slice %1 {offsets = [1, 0], sizes = [1, 32], strides = [1, 1]} : vector<2x32xf32> to vector<1x32xf32>
    %9 = vector.broadcast %7 : vector<8x1xf32> to vector<8x32xf32>
    %10 = vector.broadcast %8 : vector<1x32xf32> to vector<8x32xf32>
    %11 = arith.mulf %9, %10 : vector<8x32xf32>
    %12 = arith.addf %6, %11 : vector<8x32xf32>
    %c0_3 = arith.constant 0 : index
    %c0_4 = arith.constant 0 : index
    %13 = vector.load %arg3[%c0_3, %c0_4] : memref<1x32xf32, #tpu.memory_space<vmem>>, vector<1x32xf32>
    %14 = vector.broadcast %13 : vector<1x32xf32> to vector<8x32xf32>
    %15 = arith.addf %12, %14 : vector<8x32xf32>
    %cst = arith.constant 0.000000e+00 : f32
    %16 = vector.broadcast %cst : f32 to vector<8x32xf32>
    %17 = arith.maximumf %15, %16 : vector<8x32xf32>
    %c0_5 = arith.constant 0 : index
    %c0_6 = arith.constant 0 : index
    %18 = vector.load %arg4[%c0_5, %c0_6] : memref<32x128xf32, #tpu.memory_space<vmem>>, vector<32x128xf32>
    %cst_7 = arith.constant dense<0.000000e+00> : vector<8x128xf32>
    %19 = tpu.matmul %17, %18, %cst_7 {dimension_numbers = #tpu.dot_dimension_numbers<[1], [0], [0], [1], [0, 0, 1, 1], [], []>} : vector<8x32xf32>, vector<32x128xf32>, vector<8x128xf32> -> vector<8x128xf32>
    %c0_8 = arith.constant 0 : index
    %c0_9 = arith.constant 0 : index
    %20 = vector.load %arg5[%c0_8, %c0_9] : memref<1x128xf32, #tpu.memory_space<vmem>>, vector<1x128xf32>
    %21 = vector.broadcast %20 : vector<1x128xf32> to vector<8x128xf32>
    %22 = arith.addf %19, %21 : vector<8x128xf32>
    %23 = tpu.iota {dimensions = array<i32: 1>} : vector<8x128xi32>
    %c3_i32 = arith.constant 3 : i32
    %24 = vector.broadcast %c3_i32 : i32 to vector<8x128xi32>
    %25 = arith.cmpi slt, %23, %24 : vector<8x128xi32>
    %cst_10 = arith.constant 0xFF800000 : f32
    %26 = vector.broadcast %cst_10 : f32 to vector<8x128xf32>
    %27 = arith.select %25, %22, %26 : vector<8x128xi1>, vector<8x128xf32>
    %cst_11 = arith.constant dense<0xFF800000> : vector<8xf32>
    %28 = vector.multi_reduction <maximumf>, %27, %cst_11 [1] : vector<8x128xf32> to vector<8xf32>
    %29 = vector.shape_cast %28 : vector<8xf32> to vector<8x1xf32>
    %30 = vector.broadcast %29 : vector<8x1xf32> to vector<8x128xf32>
    %31 = arith.cmpf oeq, %27, %30 : vector<8x128xf32>
    %c128_i32 = arith.constant 128 : i32
    %32 = vector.broadcast %c128_i32 : i32 to vector<8x128xi32>
    %33 = arith.select %31, %23, %32 : vector<8x128xi1>, vector<8x128xi32>
    %cst_12 = arith.constant dense<2147483647> : vector<8xi32>
    %34 = vector.multi_reduction <minsi>, %33, %cst_12 [1] : vector<8x128xi32> to vector<8xi32>
    %35 = vector.shape_cast %34 : vector<8xi32> to vector<8x1xi32>
    %c3_i32_13 = arith.constant 3 : i32
    %36 = vector.broadcast %c3_i32_13 : i32 to vector<8x128xi32>
    %37 = arith.cmpi eq, %23, %36 : vector<8x128xi32>
    %38 = arith.sitofp %35 : vector<8x1xi32> to vector<8x1xf32>
    %cst_14 = arith.constant 0.000000e+00 : f32
    %39 = vector.shape_cast %38 : vector<8x1xf32> to vector<8x1xf32>
    %40 = vector.broadcast %39 : vector<8x1xf32> to vector<8x128xf32>
    %41 = vector.broadcast %cst_14 : f32 to vector<8x128xf32>
    %42 = arith.select %37, %40, %41 : vector<8x128xi1>, vector<8x128xf32>
    %43 = arith.select %25, %22, %42 : vector<8x128xi1>, vector<8x128xf32>
    %44 = arith.truncf %43 : vector<8x128xf32> to vector<8x128xbf16>
    %c0_15 = arith.constant 0 : index
    %c0_16 = arith.constant 0 : index
    %45 = vector.load %arg6[%c0_15, %c0_16] : memref<8x128xbf16, #tpu.memory_space<vmem>>, vector<8x128xbf16>
    tpu.vector_store %arg6[%c0_15, %c0_16], %44 {strides = array<i32>} : memref<8x128xbf16, #tpu.memory_space<vmem>>, vector<8x128xbf16>,
    return
  }
  func.func @transform_0(%arg0: i32) -> (i32, i32) {
    %c0_i32 = arith.constant 0 : i32
    %c0_i32_0 = arith.constant 0 : i32
    return %arg0, %c0_i32 : i32, i32
  }
  func.func @transform_1(%arg0: i32) -> (i32, i32) {
    %c0_i32 = arith.constant 0 : i32
    %c0_i32_0 = arith.constant 0 : i32
    %c0_i32_1 = arith.constant 0 : i32
    return %c0_i32, %c0_i32_0 : i32, i32
  }
  func.func @transform_2(%arg0: i32) -> (i32, i32) {
    %c0_i32 = arith.constant 0 : i32
    %c0_i32_0 = arith.constant 0 : i32
    %c0_i32_1 = arith.constant 0 : i32
    return %c0_i32, %c0_i32_0 : i32, i32
  }
  func.func @transform_3(%arg0: i32) -> (i32, i32) {
    %c0_i32 = arith.constant 0 : i32
    %c0_i32_0 = arith.constant 0 : i32
    %c0_i32_1 = arith.constant 0 : i32
    return %c0_i32, %c0_i32_0 : i32, i32
  }
  func.func @transform_4(%arg0: i32) -> (i32, i32) {
    %c0_i32 = arith.constant 0 : i32
    %c0_i32_0 = arith.constant 0 : i32
    %c0_i32_1 = arith.constant 0 : i32
    return %c0_i32, %c0_i32_0 : i32, i32
  }
  func.func @transform_5(%arg0: i32) -> (i32, i32) {
    %c0_i32 = arith.constant 0 : i32
    %c0_i32_0 = arith.constant 0 : i32
    return %arg0, %c0_i32 : i32, i32
  }
}

</mosaic_0001>

<bundles_post_ra>
// kernel: _dqn_forward_packed.1
= control target key start
LH: loop header
LB: loop body
LE: loop exit
PB: predicated region body
PF: predicated region fallthrough
CT: control target
= control target key end

     0   :  { %10 = vsyncpa [#allocation3], 0  ;;  %s325_s0 = inlined_call_operand.vmem [shape: f32[8,2], index: 0, kind: input, shape index: {}]   ;;  %s326_s1 = inlined_call_operand.vmem [shape: f32[2,32], index: 1, kind: input, shape index: {}]   ;;  %s327_s2 = inlined_call_operand.vmem [shape: f32[1,32], index: 2, kind: input, shape index: {}]   ;;  %s328_s3 = inlined_call_operand.hbm [shape: f32[32,128], index: 3, kind: input, shape index: {}]   ;;  %s329_s4 = inlined_call_operand.vmem [shape: f32[1,128], index: 4, kind: input, shape index: {}]   ;;  %s330_s5 = inlined_call_operand.hbm [shape: bf16[8,128], index: 5, kind: output, shape index: {}]  }
   0x1   :  { %11 = vsyncpa [#allocation4], 0  ;;  %s267_s18 = smov [#allocation2]  }
   0x2   :  { %s23_s19 = sshll.u32 %s267_s18, 4  ;;  %s24_s19 = int_to_ptr.vmem [resolvable:$true] %s23_s19 }
   0x3   :  { %s231_s20 = scalar_lea.vmem %s24_s19, 512  ;;  %p236_p1 = scmp.lt.s32.totalorder %s24_s19, %s24_s19 }
   0x4   :  { %p232_p0 = scmp.ne.s32.totalorder %s24_s19, %s231_s20  ;;  %p237_p2 = scmp.lt.s32.totalorder %s231_s20, %s231_s20 }
   0x6   :  { %p238_p3 = por %p237_p2, %p236_p1 }
   0x8   :  { %p239_p4 = pnand %p238_p3, %p232_p0 }
   0xa   :  { %242 = shalt.err (!%p239_p4)
}
   0xb   :  { %s268_s21 = smov 128   ;;  %s269_s22 = smov 8  }
   0xc   :  { %29 = dma.hbm_to_vmem [thread:$0]  %s328_s3, 512, %s24_s19, [#allocation3], %s268_s21, %s268_s21, %s269_s22  }
   0xd   :  { %263 = dma.done.wait [#allocation3], 512  }
   0xe   :  { %264 = vsyncadd [#allocation3], 4294966784  ;;  %v270_v0 = vmov 0   ;;  %v35_v1 = vld [vmem:[%s325_s0] sm:$0xff]  ;;  %v271_v2 = vmov 0.0   ;;  %v69_v3 = vld [vmem:[#allocation2 + $0x18] sm:$0xff]  ;;  %v42_v8 = vlaneseq }
   0xf   :  { %221 = vset.pattern.permute.xlu0 %v270_v0  ;;  %202 = vmatprep.subr.mxu0 %v271_v2  ;;  %v68_v4 = vld [vmem:[#allocation2 + $0x10] sm:$0xff]  ;;  %v272_v5 = vmov 1   ;;  %v67_v6 = vld [vmem:[#allocation2 + $0x8] sm:$0xff]  ;;  %v66_v7 = vld [vmem:[#allocation2] sm:$0xff]  ;;  %vm273_vm0 = vmmov 0   ;;  %vm77_vm1 = vcmask 261120  }
  0x10   :  { %39 = vperm.xlu0 %221, %v35_v1   ;;  %203 = vmatpush3.msra.mxu0 %v69_v3  ;;  %v43_v9 = vshrl.u32 %v42_v8, 7  ;;  %v36_v12 = vld [vmem:[%s326_s1] sm:$0x3]  ;;  %v152_v23 = vand.u32 127, %v42_v8  ;;  %s274_s1 = smov [#allocation5]  }
  0x11   :  { %204 = vmatprep.subr.mxu0 %v271_v2  ;;  %210 = vmatprep.mubr.msk.f32.mxu0 %vm273_vm0, %v271_v2  ;;  %v194_v19 = vld [vmem:[%s327_s2] ss:$0 sm:$0xff]  ;;  %s185_s2 = sshll.u32 %s274_s1, 4  ;;  %s186_s2 = int_to_ptr.vmem [resolvable:$true] %s185_s2 }
  0x12   :  { %205 = vmatpush3.msra.mxu0 %v68_v4  ;;  %v44_v10 = vsub.s32 0, %v43_v9  ;;  %v53_v11 = vsub.s32 1, %v43_v9  ;;  %v195_v24 = vld [vmem:[%s329_s4] ss:$0 sm:$0xff]  ;;  %vm153_vm2 = vcmp.lt.s32.totalorder %v152_v23, 3  ;;  %vm173_vm5 = vcmp.eq.s32.totalorder %v152_v23, 3  ;;  %p248_p6 = scmp.lt.s32.totalorder %s186_s2, %s186_s2 }
  0x13   :  { %206 = vmatprep.subr.mxu0 %v271_v2  ;;  %s243_s4 = scalar_lea.vmem %s186_s2, 64 }
  0x14   :  { %222 = vset.pattern.permute.xlu0 %v272_v5  ;;  %207 = vmatpush3.msra.mxu0 %v67_v6  ;;  %v45_v14 = vrot.slane %v36_v12, %v44_v10  ;;  %v54_v15 = vrot.slane %v36_v12, %v53_v11  ;;  %p244_p5 = scmp.ne.s32.totalorder %s186_s2, %s243_s4  ;;  %p249_p7 = scmp.lt.s32.totalorder %s243_s4, %s243_s4 }
  0x15   :  { %48 = vperm.xlu0 %222, %v35_v1   ;;  %208 = vmatprep.subr.mxu0 %v271_v2 }
  0x16   :  { %209 = vmatpush3.msra.mxu0 %v66_v7  ;;  %p250_p8 = por %p249_p7, %p248_p6 }
  0x18   :  { %p251_p9 = pnand %p250_p8, %p244_p5 }
  0x8b   :  { %v40_v13 = vpop.permute.xlu0 %39 }
  0x8c   :  { %v46_v17 = vmul.f32 %v45_v14, %v40_v13 }
  0x90   :  { %v49_v16 = vpop.permute.xlu0 %48 }
  0x91   :  { %v55_v18 = vmul.f32 %v54_v15, %v49_v16 }
  0x93   :  { %v56_v20 = vadd.f32 %v55_v18, %v46_v17 }
  0x95   :  { %v64_v21 = vadd.f32 %v194_v19, %v56_v20 }
  0x97   :  { %v65_v22 = vmax.f32 %v64_v21, 0.0 }
  0x99   :  { %211 = vmatmul.mubr.msk.f32.vlgmr.msra.gmra.mxu0 %vm77_vm1, %v65_v22 }
 0x159   :  { %v147_v25 = vpop.f32.mrf.mxu0 }
 0x15a   :  { %v148_v26 = vadd.f32 %v195_v24, %v147_v25 }
 0x15b   :  { %v212_v27 = vpop.f32.mrf.mxu0 }
 0x15c   :  { %v154_v28 = vsel %vm153_vm2, %v148_v26, -inf }
 0x15d   :  { %155 = vmax.xlane.f32.xlu1 %v154_v28 }
 0x1e6   :  { %v156_v29 = vpop.xlane.xlu1 %155 }
 0x1e7   :  { %vm157_vm3 = vcmp.eq.f32.partialorder %v154_v28, %v156_v29 }
 0x1e8   :  { %v158_v30 = vsel %vm157_vm3, %v152_v23, 128 }
 0x1e9   :  { %v160_v31 = vshra.s32 %v158_v30, 16  ;;  %v159_v33 = vand.u32 65535, %v158_v30 }
 0x1eb   :  { %v162_v32 = vcvt.s32.f32 %v160_v31  ;;  %v161_v35 = vcvt.s32.f32 %v159_v33 }
 0x1ed   :  { %163 = vmin.xlane.f32.xlu1 %v162_v32 }
 0x276   :  { %v164_v34 = vpop.xlane.xlu1 %163 }
 0x277   :  { %vm165_vm4 = vcmp.eq.f32.partialorder %v162_v32, %v164_v34  ;;  %v170_v37 = vcvt.f32.s32 %v164_v34 }
 0x278   :  { %v166_v36 = vsel %vm165_vm4, %v161_v35, inf }
 0x279   :  { %167 = vmin.xlane.f32.xlu1 %v166_v36  ;;  %v171_v39 = vshll.u32 %v170_v37, 16 }
 0x302   :  { %v168_v38 = vpop.xlane.xlu1 %167 }
 0x303   :  { %v169_v40 = vcvt.f32.s32 %v168_v38 }
 0x305   :  { %v172_v41 = vadd.s32 %v171_v39, %v169_v40 }
 0x307   :  { %v174_v42 = vcvt.s32.f32 %v172_v41 }
 0x309   :  { %v175_v43 = vsel %vm173_vm5, %v174_v42, 0.0 }
 0x30a   :  { %v176_v44 = vsel %vm153_vm2, %v148_v26, %v175_v43 }
 0x30b   :  { %v177_v45 = vpack.c.bf16 %v176_v44, %v176_v44 }
 0x30d   :  { %178 = vst [vmem:[#allocation5] sm:$0xf] %v177_v45 }
 0x30e   :  { %254 = shalt.err (!%p251_p9)
}
 0x30f   :  { %188 = dma.vmem_to_hbm [thread:$0]  %s186_s2, 64, %s330_s5, [#allocation4]  }
 0x310   :  { %265 = dma.done.wait [#allocation4], 64  }
 0x311   :  { %266 = vsyncadd [#allocation4], 4294967232 }
 0x312   :  { %192 = vsyncpa [#allocation3], 1 }
 0x313   :  { %193 = vsyncpa [#allocation4], 1 }

</bundles_post_ra>
